<compile_context>
chip_gen: v6e
topology: v6e:2x2x1
jax: 0.10.0
libtpu: 0.0.40
codegen_flags: <defaults>
</compile_context>

<pallas_src>
import jax
import jax.numpy as jnp
from jax.experimental import pallas as pl
from jax.experimental.pallas import tpu as pltpu


_LANE_TILE_MAX = 16384   # cap on lanes per grid step


def _vmem_budget_and_limit():
    """Generation-aware tile budget / scoped-VMEM limit (v5e/v6e: 128 MiB, v7x: 64 MiB)."""
    cap = 128 * 1024 * 1024
    try:
        cap = int(getattr(pltpu.get_tpu_info(), "vmem_capacity_bytes", cap))
    except Exception:
        pass
    limit = min((cap * 3) // 4, 64 * 1024 * 1024)   # 64 MiB on v5e/v6e, 48 MiB on v7x
    budget = min(24 * 1024 * 1024, limit // 2)      # for double-buffered tiles + weights
    return budget, limit


def _choose_lane_tile(L, n, m, out_dim, itemsize, budget):
    """Pick a lane tile (multiple of 128) from the VMEM budget; >=2 grid steps when possible."""
    if L % 128 != 0:
        return L                              # full-extent block (block dim == array dim)
    per_lane = 2 * (n + m + out_dim) * itemsize          # double-buffered in + out tiles
    w_bytes = 2 * (out_dim // 2) * (n + m) * itemsize    # (conservatively double-buffered)
    tl = (max(budget - w_bytes, 0) // max(per_lane, 1)) // 128 * 128
    tl = max(128, min(_LANE_TILE_MAX, tl))
    if tl >= L:
        # A 1-step grid can't shard across v7x's two TensorCores and doesn't
        # pipeline input/output DMAs; split into (at least) two steps.
        tl = max(128, (L // 2) // 128 * 128) if L >= 256 else L
    return tl


def _eqlin_kernel(w1_ref, w2_ref, u_ref, v_ref, o_ref):
    # w1_ref: (half, n), w2_ref: (half, m)  -- resident across lane-tile steps
    # u_ref:  (n, TL),   v_ref:  (m, TL)    -- folded activations, lane axis = B*d
    # o_ref:  (2, half, TL)                 -- two full-slice (aligned) stores
    o_ref[0, :, :] = jnp.dot(
        w1_ref[...], u_ref[...], preferred_element_type=jnp.float32
    ).astype(o_ref.dtype)
    o_ref[1, :, :] = jnp.dot(
        w2_ref[...], v_ref[...], preferred_element_type=jnp.float32
    ).astype(o_ref.dtype)


def equivariant_linear(w1, w2, u, v):
    """out[b] = concat([w1 @ u[b], w2 @ v[b]], axis=0)  -> (B, out_dim, d)."""
    B, n, d = u.shape
    Bv, m, dv = v.shape
    assert B == Bv and d == dv
    half, n_w = w1.shape
    half2, m_w = w2.shape
    assert n_w == n and m_w == m and half == half2
    out_dim = 2 * half

    out_dtype = u.dtype
    # Keep weight/activation dtypes consistent (weights are tiny; casting them is
    # free compared with streaming the activations).
    if w1.dtype != out_dtype:
        w1 = w1.astype(out_dtype)
    if w2.dtype != out_dtype:
        w2 = w2.astype(out_dtype)

    L = B * d
    # Fold batch into the lane axis: (B, c, d) -> (c, B*d).
    uf = jnp.transpose(u, (1, 0, 2)).reshape(n, L)
    vf = jnp.transpose(v, (1, 0, 2)).reshape(m, L)

    # Rare fallback: huge, non-128-aligned lane count -> pad to a multiple of 128
    # so we can still tile (otherwise one full-extent block could blow VMEM).
    L_k = L
    if L % 128 != 0 and L > _LANE_TILE_MAX:
        L_k = -(-L // 128) * 128
        uf = jnp.pad(uf, ((0, 0), (0, L_k - L)))
        vf = jnp.pad(vf, ((0, 0), (0, L_k - L)))

    itemsize = jnp.dtype(out_dtype).itemsize
    budget, vmem_limit = _vmem_budget_and_limit()
    tl = _choose_lane_tile(L_k, n, m, out_dim, itemsize, budget)
    grid = (pl.cdiv(L_k, tl),)

    cost = pl.CostEstimate(
        flops=2 * half * (n + m) * L,
        transcendentals=0,
        bytes_accessed=itemsize * ((n + m) * L + out_dim * L + half * (n + m)),
    )

    out_f = pl.pallas_call(
        _eqlin_kernel,
        out_shape=jax.ShapeDtypeStruct((2, half, L_k), out_dtype),
        grid_spec=pltpu.PrefetchScalarGridSpec(
            num_scalar_prefetch=0,
            grid=grid,
            in_specs=[
                pl.BlockSpec((half, n), lambda j: (0, 0)),   # w1 (resident)
                pl.BlockSpec((half, m), lambda j: (0, 0)),   # w2 (resident)
                pl.BlockSpec((n, tl), lambda j: (0, j)),     # folded u
                pl.BlockSpec((m, tl), lambda j: (0, j)),     # folded v
            ],
            out_specs=pl.BlockSpec((2, half, tl), lambda j: (0, 0, j)),
        ),
        compiler_params=pltpu.CompilerParams(
            dimension_semantics=("parallel",),
            vmem_limit_bytes=vmem_limit,
            # Let XLA fuse the (B,n,d)->(n,B*d) fold into the activation reads.
            allow_input_fusion=[False, False, True, True],
        ),
        cost_estimate=cost,
    )(w1, w2, uf, vf)

    # (2, half, L) -> (out_dim, L) is a contiguous (free) reshape; then unfold lanes.
    out_f = out_f.reshape(out_dim, L_k)[:, :L]
    return jnp.transpose(out_f.reshape(out_dim, B, d), (1, 0, 2))


def _reference(w1, w2, u, v):
    return jnp.concatenate(
        [jnp.einsum("on,bnd->bod", w1, u), jnp.einsum("om,bmd->bod", w2, v)],
        axis=1,
    )


if __name__ == "__main__":
    key = jax.random.PRNGKey(0)

    # --- Test 1: small shapes (L = B*d = 16 < 128 -> single full-extent block). ---
    B, n, m, d, out_dim = 2, 16, 16, 8, 32
    half = out_dim // 2
    k1, k2, ku, kv, key = jax.random.split(key, 5)
    w1 = jax.random.normal(k1, (half, n), dtype=jnp.float32) / (n ** 0.5)
    w2 = jax.random.normal(k2, (half, m), dtype=jnp.float32) / (m ** 0.5)
    u = jax.random.normal(ku, (B, n, d), dtype=jnp.float32)
    v = jax.random.normal(kv, (B, m, d), dtype=jnp.float32)
    out = jax.block_until_ready(equivariant_linear(w1, w2, u, v))
    ref = _reference(w1, w2, u, v)
    assert out.shape == (B, out_dim, d)
    assert jnp.allclose(out, ref, atol=1e-5, rtol=1e-5)

    # --- Test 2: larger contraction dims. ---
    B, n, m, d, out_dim = 2, 160, 160, 8, 32
    half = out_dim // 2
    k1, k2, ku, kv, key = jax.random.split(key, 5)
    w1 = jax.random.normal(k1, (half, n), dtype=jnp.float32) / (n ** 0.5)
    w2 = jax.random.normal(k2, (half, m), dtype=jnp.float32) / (m ** 0.5)
    u = jax.random.normal(ku, (B, n, d), dtype=jnp.float32)
    v = jax.random.normal(kv, (B, m, d), dtype=jnp.float32)
    out2 = jax.block_until_ready(equivariant_linear(w1, w2, u, v))
    ref2 = _reference(w1, w2, u, v)
    assert out2.shape == (B, out_dim, d)
    assert jnp.allclose(out2, ref2, atol=1e-4, rtol=1e-4)

    # --- Test 3: multi-step grid with a ragged lane tail and half not a multiple
    #     of the sublane count (exercises the aligned (2, half, L) output slab). ---
    B, n, m, d, out_dim = 4, 24, 40, 160, 20   # L = 640 -> tl = 256, grid = 3
    half = out_dim // 2
    k1, k2, ku, kv, key = jax.random.split(key, 5)
    w1 = jax.random.normal(k1, (half, n), dtype=jnp.float32) / (n ** 0.5)
    w2 = jax.random.normal(k2, (half, m), dtype=jnp.float32) / (m ** 0.5)
    u = jax.random.normal(ku, (B, n, d), dtype=jnp.float32)
    v = jax.random.normal(kv, (B, m, d), dtype=jnp.float32)
    out3 = jax.block_until_ready(equivariant_linear(w1, w2, u, v))
    ref3 = _reference(w1, w2, u, v)
    assert out3.shape == (B, out_dim, d)
    assert jnp.allclose(out3, ref3, atol=1e-4, rtol=1e-4)

    print("KERNEL_OK")
</pallas_src>

<mosaic_0001>
module attributes {stable_mosaic.version = 11 : i64} {
  func.func @_eqlin_kernel(%arg0: i32, %arg1: memref<16x16xf32, #tpu.memory_space<vmem>>, %arg2: memref<16x16xf32, #tpu.memory_space<vmem>>, %arg3: memref<16x16xf32, #tpu.memory_space<vmem>>, %arg4: memref<16x16xf32, #tpu.memory_space<vmem>>, %arg5: memref<2x16x16xf32, #tpu.memory_space<vmem>>) attributes {dimension_semantics = [#tpu.dimension_semantics<parallel>], iteration_bounds = array<i64: 1>, scalar_prefetch = 0 : i64, scratch_operands = 0 : i64, tpu.core_type = #tpu.core_type<tc>, window_params = [{pipeline_mode = #tpu.pipeline_mode<synchronous>, transform_indices = @transform_0, window_bounds = array<i64: 16, 16>}, {pipeline_mode = #tpu.pipeline_mode<synchronous>, transform_indices = @transform_1, window_bounds = array<i64: 16, 16>}, {transform_indices = @transform_2, window_bounds = array<i64: 16, 16>}, {transform_indices = @transform_3, window_bounds = array<i64: 16, 16>}, {transform_indices = @transform_4, window_bounds = array<i64: 2, 16, 16>}]} {
    %c0 = arith.constant 0 : index
    %c0_0 = arith.constant 0 : index
    %0 = vector.load %arg1[%c0, %c0_0] : memref<16x16xf32, #tpu.memory_space<vmem>>, vector<16x16xf32>
    %c0_1 = arith.constant 0 : index
    %c0_2 = arith.constant 0 : index
    %1 = vector.load %arg3[%c0_1, %c0_2] : memref<16x16xf32, #tpu.memory_space<vmem>>, vector<16x16xf32>
    %cst = arith.constant dense<0.000000e+00> : vector<16x16xf32>
    %2 = tpu.matmul %0, %1, %cst {dimension_numbers = #tpu.dot_dimension_numbers<[1], [0], [0], [1], [0, 0, 1, 1], [], []>} : vector<16x16xf32>, vector<16x16xf32>, vector<16x16xf32> -> vector<16x16xf32>
    %c0_3 = arith.constant 0 : index
    %c0_4 = arith.constant 0 : index
    %c0_5 = arith.constant 0 : index
    %3 = vector.load %arg5[%c0_3, %c0_4, %c0_5] : memref<2x16x16xf32, #tpu.memory_space<vmem>>, vector<1x16x16xf32>
    %4 = vector.shape_cast %3 : vector<1x16x16xf32> to vector<16x16xf32>
    %5 = vector.shape_cast %2 : vector<16x16xf32> to vector<1x16x16xf32>
    tpu.vector_store %arg5[%c0_3, %c0_4, %c0_5], %5 {strides = array<i32>} : memref<2x16x16xf32, #tpu.memory_space<vmem>>, vector<1x16x16xf32>,
    %c0_6 = arith.constant 0 : index
    %c0_7 = arith.constant 0 : index
    %6 = vector.load %arg2[%c0_6, %c0_7] : memref<16x16xf32, #tpu.memory_space<vmem>>, vector<16x16xf32>
    %c0_8 = arith.constant 0 : index
    %c0_9 = arith.constant 0 : index
    %7 = vector.load %arg4[%c0_8, %c0_9] : memref<16x16xf32, #tpu.memory_space<vmem>>, vector<16x16xf32>
    %cst_10 = arith.constant dense<0.000000e+00> : vector<16x16xf32>
    %8 = tpu.matmul %6, %7, %cst_10 {dimension_numbers = #tpu.dot_dimension_numbers<[1], [0], [0], [1], [0, 0, 1, 1], [], []>} : vector<16x16xf32>, vector<16x16xf32>, vector<16x16xf32> -> vector<16x16xf32>
    %c1 = arith.constant 1 : index
    %c0_11 = arith.constant 0 : index
    %c0_12 = arith.constant 0 : index
    %9 = vector.load %arg5[%c1, %c0_11, %c0_12] : memref<2x16x16xf32, #tpu.memory_space<vmem>>, vector<1x16x16xf32>
    %10 = vector.shape_cast %9 : vector<1x16x16xf32> to vector<16x16xf32>
    %11 = vector.shape_cast %8 : vector<16x16xf32> to vector<1x16x16xf32>
    tpu.vector_store %arg5[%c1, %c0_11, %c0_12], %11 {strides = array<i32>} : memref<2x16x16xf32, #tpu.memory_space<vmem>>, vector<1x16x16xf32>,
    return
  }
  func.func @transform_0(%arg0: i32) -> (i32, i32) {
    %c0_i32 = arith.constant 0 : i32
    %c0_i32_0 = arith.constant 0 : i32
    %c0_i32_1 = arith.constant 0 : i32
    return %c0_i32, %c0_i32_0 : i32, i32
  }
  func.func @transform_1(%arg0: i32) -> (i32, i32) {
    %c0_i32 = arith.constant 0 : i32
    %c0_i32_0 = arith.constant 0 : i32
    %c0_i32_1 = arith.constant 0 : i32
    return %c0_i32, %c0_i32_0 : i32, i32
  }
  func.func @transform_2(%arg0: i32) -> (i32, i32) {
    %c0_i32 = arith.constant 0 : i32
    %c0_i32_0 = arith.constant 0 : i32
    return %c0_i32, %arg0 : i32, i32
  }
  func.func @transform_3(%arg0: i32) -> (i32, i32) {
    %c0_i32 = arith.constant 0 : i32
    %c0_i32_0 = arith.constant 0 : i32
    return %c0_i32, %arg0 : i32, i32
  }
  func.func @transform_4(%arg0: i32) -> (i32, i32, i32) {
    %c0_i32 = arith.constant 0 : i32
    %c0_i32_0 = arith.constant 0 : i32
    %c0_i32_1 = arith.constant 0 : i32
    return %c0_i32, %c0_i32_0, %arg0 : i32, i32, i32
  }
}

</mosaic_0001>

<bundles_post_ra>
// kernel: tpu_custom_call.1
= control target key start
LH: loop header
LB: loop body
LE: loop exit
PB: predicated region body
PF: predicated region fallthrough
CT: control target
= control target key end

     0   :  { %9 = vsyncpa [#allocation3], 0  ;;  %s479_s0 = inlined_call_operand.hbm [shape: f32[16,16], index: 0, kind: input, shape index: {}]   ;;  %s480_s1 = inlined_call_operand.hbm [shape: f32[16,16], index: 1, kind: input, shape index: {}]   ;;  %s481_s2 = inlined_call_operand.hbm [shape: f32[16,16], index: 2, kind: input, shape index: {}]   ;;  %s482_s3 = inlined_call_operand.hbm [shape: f32[16,16], index: 3, kind: input, shape index: {}]   ;;  %s483_s4 = inlined_call_operand.hbm [shape: f32[2,16,16], index: 4, kind: output, shape index: {}]  }
   0x1   :  { %10 = vsyncpa [#allocation6], 0 }
   0x2   :  { %11 = vsyncpa [#allocation9], 0 }
   0x3   :  { %12 = vsyncpa [#allocation4], 0  ;;  %s409_s15 = smov [#allocation5]   ;;  %s410_s17 = smov [#allocation2]  }
   0x4   :  { %s30_s16 = sshll.u32 %s409_s15, 4  ;;  %s18_s18 = sshll.u32 %s410_s17, 4  ;;  %s31_s16 = int_to_ptr.vmem [resolvable:$true] %s30_s16  ;;  %s19_s18 = int_to_ptr.vmem [resolvable:$true] %s18_s18 }
   0x5   :  { %s309_s19 = scalar_lea.vmem %s31_s16, 256  ;;  %p314_p1 = scmp.lt.s32.totalorder %s31_s16, %s31_s16 }
   0x6   :  { %p310_p0 = scmp.ne.s32.totalorder %s31_s16, %s309_s19  ;;  %p315_p2 = scmp.lt.s32.totalorder %s309_s19, %s309_s19 }
   0x8   :  { %p316_p3 = por %p315_p2, %p314_p1 }
   0xa   :  { %p317_p4 = pnand %p316_p3, %p310_p0 }
   0xc   :  { %320 = shalt.err (!%p317_p4)
}
   0xd   :  { %s411_s20 = smov 128   ;;  %s412_s21 = smov 8  }
   0xe   :  { %36 = dma.hbm_to_vmem [thread:$0]  %s480_s1, 256, %s31_s16, [#allocation6], %s411_s20, %s411_s20, %s412_s21  }
   0xf   :  { %s329_s24 = scalar_lea.vmem %s19_s18, 256  ;;  %p334_p6 = scmp.lt.s32.totalorder %s19_s18, %s19_s18 }
  0x10   :  { %p330_p5 = scmp.ne.s32.totalorder %s19_s18, %s329_s24  ;;  %p335_p7 = scmp.lt.s32.totalorder %s329_s24, %s329_s24 }
  0x12   :  { %p336_p8 = por %p335_p7, %p334_p6 }
  0x14   :  { %p337_p9 = pnand %p336_p8, %p330_p5 }
  0x16   :  { %340 = shalt.err (!%p337_p9)
}
  0x17   :  { %24 = dma.hbm_to_vmem [thread:$0]  %s479_s0, 256, %s19_s18, [#allocation3], %s411_s20, %s411_s20, %s412_s21  }
  0x18   :  { %s413_s27 = smov [#allocation7]   ;;  %s414_s29 = smov [#allocation8]  }
  0x19   :  { %s42_s28 = sshll.u32 %s413_s27, 4  ;;  %s54_s30 = sshll.u32 %s414_s29, 4  ;;  %s43_s28 = int_to_ptr.vmem [resolvable:$true] %s42_s28  ;;  %s55_s30 = int_to_ptr.vmem [resolvable:$true] %s54_s30 }
  0x1a   :  { %s349_s1 = scalar_lea.vmem %s43_s28, 256  ;;  %p354_p11 = scmp.lt.s32.totalorder %s43_s28, %s43_s28 }
  0x1b   :  { %p350_p10 = scmp.ne.s32.totalorder %s43_s28, %s349_s1  ;;  %p355_p12 = scmp.lt.s32.totalorder %s349_s1, %s349_s1 }
  0x1d   :  { %p356_p13 = por %p355_p12, %p354_p11 }
  0x1f   :  { %p357_p0 = pnand %p356_p13, %p350_p10 }
  0x21   :  { %360 = shalt.err (!%p357_p0)
}
  0x22   :  { %48 = dma.hbm_to_vmem [thread:$0]  %s481_s2, 256, %s43_s28, [#allocation6], %s411_s20, %s411_s20, %s412_s21  }
  0x23   :  { %s369_s0 = scalar_lea.vmem %s55_s30, 256  ;;  %p374_p2 = scmp.lt.s32.totalorder %s55_s30, %s55_s30 }
  0x24   :  { %p370_p1 = scmp.ne.s32.totalorder %s55_s30, %s369_s0  ;;  %p375_p3 = scmp.lt.s32.totalorder %s369_s0, %s369_s0 }
  0x26   :  { %p376_p4 = por %p375_p3, %p374_p2 }
  0x28   :  { %p377_p5 = pnand %p376_p4, %p370_p1 }
  0x2a   :  { %380 = shalt.err (!%p377_p5)
}
  0x2b   :  { %60 = dma.hbm_to_vmem [thread:$0]  %s482_s3, 256, %s55_s30, [#allocation9], %s411_s20, %s411_s20, %s412_s21  }
  0x2c   :  { %401 = dma.done.wait [#allocation3], 256  }
  0x2d   :  { %402 = vsyncadd [#allocation3], 4294967040 }
  0x2e   :  { %403 = dma.done.wait [#allocation6], 512  }
  0x2f   :  { %404 = vsyncadd [#allocation6], 4294966784 }
  0x30   :  { %405 = dma.done.wait [#allocation9], 256  }
  0x31   :  { %406 = vsyncadd [#allocation9], 4294967040  ;;  %v76_v0 = vld [vmem:[#allocation7 + $0x8] sm:$0xff]  ;;  %v164_v1 = vld [vmem:[#allocation8 + $0x8] sm:$0xff]  ;;  %vm77_vm0 = vcmask 130048   ;;  %s415_s2 = smov [#allocation10]  }
  0x32   :  { %v75_v2 = vld [vmem:[#allocation7] sm:$0xff]  ;;  %280 = vmatprep.subr.mxu0 %v76_v0  ;;  %287 = vmatprep.subr.mxu1 %v164_v1  ;;  %v163_v3 = vld [vmem:[#allocation8] sm:$0xff]  ;;  %v74_v6 = vld [vmem:[#allocation2 + $0x8] sm:$0xff]  ;;  %s254_s3 = sshll.u32 %s415_s2, 4  ;;  %s255_s3 = int_to_ptr.vmem [resolvable:$true] %s254_s3 }
  0x33   :  { %v73_v4 = vld [vmem:[#allocation2] sm:$0xff]  ;;  %281 = vmatpush3.msra.mxu0 %v76_v0  ;;  %288 = vmatpush3.msra.mxu1 %v164_v1  ;;  %v161_v5 = vld [vmem:[#allocation5] sm:$0xff]  ;;  %v162_v7 = vld [vmem:[#allocation5 + $0x8] sm:$0xff]  ;;  %s381_s9 = scalar_lea.vmem %s255_s3, 512  ;;  %p386_p7 = scmp.lt.s32.totalorder %s255_s3, %s255_s3 }
  0x34   :  { %282 = vmatprep.subr.mxu0 %v75_v2  ;;  %289 = vmatprep.subr.mxu1 %v163_v3  ;;  %p382_p6 = scmp.ne.s32.totalorder %s255_s3, %s381_s9  ;;  %p387_p8 = scmp.lt.s32.totalorder %s381_s9, %s381_s9 }
  0x35   :  { %283 = vmatpush3.msra.mxu0 %v75_v2  ;;  %284 = vmatprep.mubr.msk.f32.mxu0 %vm77_vm0, %v73_v4 }
  0x36   :  { %290 = vmatpush3.msra.mxu1 %v163_v3  ;;  %291 = vmatprep.mubr.msk.f32.mxu1 %vm77_vm0, %v161_v5  ;;  %p388_p9 = por %p387_p8, %p386_p7 }
  0x37   :  { %285 = vmatmul.mubr.msk.f32.vlgmr.msra.gmra.mxu0 %vm77_vm0, %v74_v6  ;;  %292 = vmatmul.mubr.msk.f32.vlgmr.msra.gmra.mxu1 %vm77_vm0, %v162_v7 }
  0x38   :  { %p389_p10 = pnand %p388_p9, %p382_p6 }
  0xf7   :  { %v286_v8 = vpop.f32.mrf.mxu0  ;;  %v293_v9 = vpop.f32.mrf.mxu1 }
  0xf8   :  { %160 = vst.msk [vmem:[#allocation10 + $0x8] sm:$0xff] %vm77_vm0, %v286_v8  ;;  %248 = vst.msk [vmem:[#allocation10 + $0x18] sm:$0xff] %vm77_vm0, %v293_v9 }
  0xf9   :  { %v150_v10 = vpop.f32.mrf.mxu0  ;;  %v237_v11 = vpop.f32.mrf.mxu1 }
  0xfa   :  { %159 = vst.msk [vmem:[#allocation10] sm:$0xff] %vm77_vm0, %v150_v10  ;;  %247 = vst.msk [vmem:[#allocation10 + $0x10] sm:$0xff] %vm77_vm0, %v237_v11 }
  0xfb   :  { %392 = shalt.err (!%p389_p10)
}
  0xfc   :  { %260 = dma.vmem_to_hbm [thread:$0]  %s255_s3, 512, %s483_s4, [#allocation4], %s411_s20, %s411_s20, %s412_s21  }
  0xfd   :  { %407 = dma.done.wait [#allocation4], 512  }
  0xfe   :  { %408 = vsyncadd [#allocation4], 4294966784 }
  0xff   :  { %264 = vsyncpa [#allocation3], 1 }
 0x100   :  { %265 = vsyncpa [#allocation6], 1 }
 0x101   :  { %266 = vsyncpa [#allocation9], 1 }
 0x102   :  { %267 = vsyncpa [#allocation4], 1 }

</bundles_post_ra>
